<compile_context>
chip_gen: v5e
topology: v5e:2x2
jax: 0.10.0
libtpu: 0.0.40
codegen_flags: <defaults>
</compile_context>

<pallas_src>
import functools

import jax
import jax.numpy as jnp
from jax.experimental import pallas as pl
from jax.experimental.pallas import tpu as pltpu


def _round_up(x, m):
    return ((x + m - 1) // m) * m


def _pad_axis(a, target, axis):
    pad = target - a.shape[axis]
    if pad == 0:
        return a
    widths = [(0, 0)] * a.ndim
    widths[axis] = (0, pad)
    return jnp.pad(a, widths)


def _mlp_fused_kernel(*refs, n_layers):
    """Fused MLP body.

    refs = (x_ref, w0_ref, b0_ref, ..., w{L-1}_ref, b{L-1}_ref, o_ref)
    Every layer: h = relu?(h @ W + b), accumulation in f32, activations stay
    in vregs (no scratch, no reduction grid axis).
    """
    x_ref = refs[0]
    o_ref = refs[-1]
    param_refs = refs[1:-1]

    h = x_ref[...]
    for li in range(n_layers):
        w = param_refs[2 * li][...]
        b = param_refs[2 * li + 1][...]
        h = jnp.dot(h, w, preferred_element_type=jnp.float32)
        h = h + b.astype(jnp.float32)
        if li != n_layers - 1:
            h = jnp.maximum(h, 0.0)  # ReLU (Dropout = identity in eval)
    o_ref[...] = h.astype(o_ref.dtype)


def classifier_head_forward(x, params, *, tm=None):
    """Forward pass: (Linear -> ReLU -> Dropout[eval])* -> Linear.

    x: [M, input_dim]; params: list of (W [in, out], b [out]).
    Returns [M, num_classes].
    """
    M, K = x.shape
    n_layers = len(params)
    num_classes = params[-1][0].shape[1]

    # Feature dims along the chain, padded to lane-dense multiples of 128.
    dims = [K] + [w.shape[1] for (w, _) in params]
    pdims = [_round_up(d, 128) for d in dims]

    # Batch tile: at least 8 sublanes, capped at 128 rows per grid step.
    if tm is None:
        tm = 128 if M >= 128 else _round_up(M, 8)
    Mpad = _round_up(M, tm)

    # Rough VMEM sanity check (double-buffered x/out tiles + resident params).
    param_bytes = sum(4 * pdims[i] * pdims[i + 1] + 4 * pdims[i + 1]
                      for i in range(n_layers))
    tile_bytes = 2 * 4 * tm * (pdims[0] + pdims[-1])
    assert param_bytes + tile_bytes < 24 * 1024 * 1024, (
        "MLP too large to keep resident in VMEM; use a tiled per-layer path."
    )  # TODO(synk): fall back to a K/N-tiled per-layer kernel for huge MLPs.

    # Zero-pad input and parameters. Zero pad-columns stay zero through
    # Linear (zero weight rows) + ReLU, so results are exact.
    x_p = _pad_axis(_pad_axis(x, pdims[0], 1), Mpad, 0)

    flat_args = [x_p]
    in_specs = [pl.BlockSpec((tm, pdims[0]), lambda i: (i, 0))]
    for li, (w, b) in enumerate(params):
        kin, kout = pdims[li], pdims[li + 1]
        w_p = _pad_axis(_pad_axis(w, kin, 0), kout, 1)
        b_p = _pad_axis(b, kout, 0).reshape(1, kout)
        flat_args += [w_p, b_p]
        # Full-array blocks with constant index_map -> resident in VMEM.
        in_specs += [
            pl.BlockSpec((kin, kout), lambda i: (0, 0)),
            pl.BlockSpec((1, kout), lambda i: (0, 0)),
        ]

    out_p = pl.pallas_call(
        functools.partial(_mlp_fused_kernel, n_layers=n_layers),
        out_shape=jax.ShapeDtypeStruct((Mpad, pdims[-1]), x.dtype),
        grid_spec=pltpu.PrefetchScalarGridSpec(
            num_scalar_prefetch=0,
            grid=(Mpad // tm,),
            in_specs=in_specs,
            out_specs=pl.BlockSpec((tm, pdims[-1]), lambda i: (i, 0)),
        ),
        compiler_params=pltpu.CompilerParams(
            dimension_semantics=("parallel",),
        ),
    )(*flat_args)

    # Strip batch / lane padding in plain JAX (free in XLA).
    return out_p[:M, :num_classes]


def init_classifier_head_params(key, input_dim, hidden_dims, num_classes,
                                dtype=jnp.float32):
    """Deterministic parameter init (Kaiming-uniform-like, as in nn.Linear)."""
    dims = [input_dim] + list(hidden_dims) + [num_classes]
    params = []
    for i in range(len(dims) - 1):
        key, kw, kb = jax.random.split(key, 3)
        fan_in, fan_out = dims[i], dims[i + 1]
        bound = 1.0 / jnp.sqrt(fan_in)
        # Stored as [in, out] (transposed vs. PyTorch's [out, in]).
        w = jax.random.uniform(kw, (fan_in, fan_out), dtype, -bound, bound)
        b = jax.random.uniform(kb, (fan_out,), dtype, -bound, bound)
        params.append((w, b))
    return params


def classifier_head_ref(x, params):
    """Plain-JAX reference for verification."""
    h = x
    n_layers = len(params)
    for li, (w, b) in enumerate(params):
        h = h @ w + b
        if li != n_layers - 1:
            h = jnp.maximum(h, 0.0)
    return h


if __name__ == "__main__":
    key = jax.random.PRNGKey(0)
    k_in, k_params = jax.random.split(key)

    batch = 8
    input_dim = 128
    hidden_dims = [256, 128]
    num_classes = 10

    x = jax.random.normal(k_in, (batch, input_dim), dtype=jnp.float32)
    params = init_classifier_head_params(
        k_params, input_dim, hidden_dims, num_classes
    )

    out = classifier_head_forward(x, params)
    out = jax.block_until_ready(out)

    ref = classifier_head_ref(x, params)
    assert out.shape == (batch, num_classes), out.shape
    assert jnp.allclose(out, ref, atol=1e-5, rtol=1e-5), (
        float(jnp.max(jnp.abs(out - ref)))
    )

    print("KERNEL_OK")
</pallas_src>

<mosaic_0001>
module attributes {stable_mosaic.version = 11 : i64} {
  func.func @_mlp_fused_kernel(%arg0: i32, %arg1: memref<8x128xf32, #tpu.memory_space<vmem>>, %arg2: memref<128x256xf32, #tpu.memory_space<vmem>>, %arg3: memref<1x256xf32, #tpu.memory_space<vmem>>, %arg4: memref<256x128xf32, #tpu.memory_space<vmem>>, %arg5: memref<1x128xf32, #tpu.memory_space<vmem>>, %arg6: memref<128x128xf32, #tpu.memory_space<vmem>>, %arg7: memref<1x128xf32, #tpu.memory_space<vmem>>, %arg8: memref<8x128xf32, #tpu.memory_space<vmem>>) attributes {dimension_semantics = [#tpu.dimension_semantics<parallel>], iteration_bounds = array<i64: 1>, scalar_prefetch = 0 : i64, scratch_operands = 0 : i64, tpu.core_type = #tpu.core_type<tc>, window_params = [{transform_indices = @transform_0, window_bounds = array<i64: 8, 128>}, {pipeline_mode = #tpu.pipeline_mode<synchronous>, transform_indices = @transform_1, window_bounds = array<i64: 128, 256>}, {pipeline_mode = #tpu.pipeline_mode<synchronous>, transform_indices = @transform_2, window_bounds = array<i64: 1, 256>}, {pipeline_mode = #tpu.pipeline_mode<synchronous>, transform_indices = @transform_3, window_bounds = array<i64: 256, 128>}, {pipeline_mode = #tpu.pipeline_mode<synchronous>, transform_indices = @transform_4, window_bounds = array<i64: 1, 128>}, {pipeline_mode = #tpu.pipeline_mode<synchronous>, transform_indices = @transform_5, window_bounds = array<i64: 128, 128>}, {pipeline_mode = #tpu.pipeline_mode<synchronous>, transform_indices = @transform_6, window_bounds = array<i64: 1, 128>}, {transform_indices = @transform_7, window_bounds = array<i64: 8, 128>}]} {
    %c0 = arith.constant 0 : index
    %c0_0 = arith.constant 0 : index
    %0 = vector.load %arg1[%c0, %c0_0] : memref<8x128xf32, #tpu.memory_space<vmem>>, vector<8x128xf32>
    %c0_1 = arith.constant 0 : index
    %c0_2 = arith.constant 0 : index
    %1 = vector.load %arg2[%c0_1, %c0_2] : memref<128x256xf32, #tpu.memory_space<vmem>>, vector<128x256xf32>
    %c0_3 = arith.constant 0 : index
    %c0_4 = arith.constant 0 : index
    %2 = vector.load %arg3[%c0_3, %c0_4] : memref<1x256xf32, #tpu.memory_space<vmem>>, vector<1x256xf32>
    %cst = arith.constant dense<0.000000e+00> : vector<8x256xf32>
    %3 = tpu.matmul %0, %1, %cst {dimension_numbers = #tpu.dot_dimension_numbers<[1], [0], [0], [1], [0, 0, 1, 1], [], []>} : vector<8x128xf32>, vector<128x256xf32>, vector<8x256xf32> -> vector<8x256xf32>
    %4 = vector.broadcast %2 : vector<1x256xf32> to vector<8x256xf32>
    %5 = arith.addf %3, %4 : vector<8x256xf32>
    %cst_5 = arith.constant 0.000000e+00 : f32
    %6 = vector.broadcast %cst_5 : f32 to vector<8x256xf32>
    %7 = arith.maximumf %5, %6 : vector<8x256xf32>
    %c0_6 = arith.constant 0 : index
    %c0_7 = arith.constant 0 : index
    %8 = vector.load %arg4[%c0_6, %c0_7] : memref<256x128xf32, #tpu.memory_space<vmem>>, vector<256x128xf32>
    %c0_8 = arith.constant 0 : index
    %c0_9 = arith.constant 0 : index
    %9 = vector.load %arg5[%c0_8, %c0_9] : memref<1x128xf32, #tpu.memory_space<vmem>>, vector<1x128xf32>
    %cst_10 = arith.constant dense<0.000000e+00> : vector<8x128xf32>
    %10 = tpu.matmul %7, %8, %cst_10 {dimension_numbers = #tpu.dot_dimension_numbers<[1], [0], [0], [1], [0, 0, 1, 1], [], []>} : vector<8x256xf32>, vector<256x128xf32>, vector<8x128xf32> -> vector<8x128xf32>
    %11 = vector.broadcast %9 : vector<1x128xf32> to vector<8x128xf32>
    %12 = arith.addf %10, %11 : vector<8x128xf32>
    %cst_11 = arith.constant 0.000000e+00 : f32
    %13 = vector.broadcast %cst_11 : f32 to vector<8x128xf32>
    %14 = arith.maximumf %12, %13 : vector<8x128xf32>
    %c0_12 = arith.constant 0 : index
    %c0_13 = arith.constant 0 : index
    %15 = vector.load %arg6[%c0_12, %c0_13] : memref<128x128xf32, #tpu.memory_space<vmem>>, vector<128x128xf32>
    %c0_14 = arith.constant 0 : index
    %c0_15 = arith.constant 0 : index
    %16 = vector.load %arg7[%c0_14, %c0_15] : memref<1x128xf32, #tpu.memory_space<vmem>>, vector<1x128xf32>
    %cst_16 = arith.constant dense<0.000000e+00> : vector<8x128xf32>
    %17 = tpu.matmul %14, %15, %cst_16 {dimension_numbers = #tpu.dot_dimension_numbers<[1], [0], [0], [1], [0, 0, 1, 1], [], []>} : vector<8x128xf32>, vector<128x128xf32>, vector<8x128xf32> -> vector<8x128xf32>
    %18 = vector.broadcast %16 : vector<1x128xf32> to vector<8x128xf32>
    %19 = arith.addf %17, %18 : vector<8x128xf32>
    %c0_17 = arith.constant 0 : index
    %c0_18 = arith.constant 0 : index
    %20 = vector.load %arg8[%c0_17, %c0_18] : memref<8x128xf32, #tpu.memory_space<vmem>>, vector<8x128xf32>
    tpu.vector_store %arg8[%c0_17, %c0_18], %19 {strides = array<i32>} : memref<8x128xf32, #tpu.memory_space<vmem>>, vector<8x128xf32>,
    return
  }
  func.func @transform_0(%arg0: i32) -> (i32, i32) {
    %c0_i32 = arith.constant 0 : i32
    %c0_i32_0 = arith.constant 0 : i32
    return %arg0, %c0_i32 : i32, i32
  }
  func.func @transform_1(%arg0: i32) -> (i32, i32) {
    %c0_i32 = arith.constant 0 : i32
    %c0_i32_0 = arith.constant 0 : i32
    %c0_i32_1 = arith.constant 0 : i32
    return %c0_i32, %c0_i32_0 : i32, i32
  }
  func.func @transform_2(%arg0: i32) -> (i32, i32) {
    %c0_i32 = arith.constant 0 : i32
    %c0_i32_0 = arith.constant 0 : i32
    %c0_i32_1 = arith.constant 0 : i32
    return %c0_i32, %c0_i32_0 : i32, i32
  }
  func.func @transform_3(%arg0: i32) -> (i32, i32) {
    %c0_i32 = arith.constant 0 : i32
    %c0_i32_0 = arith.constant 0 : i32
    %c0_i32_1 = arith.constant 0 : i32
    return %c0_i32, %c0_i32_0 : i32, i32
  }
  func.func @transform_4(%arg0: i32) -> (i32, i32) {
    %c0_i32 = arith.constant 0 : i32
    %c0_i32_0 = arith.constant 0 : i32
    %c0_i32_1 = arith.constant 0 : i32
    return %c0_i32, %c0_i32_0 : i32, i32
  }
  func.func @transform_5(%arg0: i32) -> (i32, i32) {
    %c0_i32 = arith.constant 0 : i32
    %c0_i32_0 = arith.constant 0 : i32
    %c0_i32_1 = arith.constant 0 : i32
    return %c0_i32, %c0_i32_0 : i32, i32
  }
  func.func @transform_6(%arg0: i32) -> (i32, i32) {
    %c0_i32 = arith.constant 0 : i32
    %c0_i32_0 = arith.constant 0 : i32
    %c0_i32_1 = arith.constant 0 : i32
    return %c0_i32, %c0_i32_0 : i32, i32
  }
  func.func @transform_7(%arg0: i32) -> (i32, i32) {
    %c0_i32 = arith.constant 0 : i32
    %c0_i32_0 = arith.constant 0 : i32
    return %arg0, %c0_i32 : i32, i32
  }
}

</mosaic_0001>

<bundles_post_ra>
// kernel: tpu_custom_call.1
= control target key start
LH: loop header
LB: loop body
LE: loop exit
PB: predicated region body
PF: predicated region fallthrough
CT: control target
= control target key end

     0   :  { %12 = vsyncpa [#allocation3], 0  ;;  %s557_s0 = inlined_call_operand.hbm [shape: f32[8,128], index: 0, kind: input, shape index: {}]   ;;  %s558_s1 = inlined_call_operand.hbm [shape: f32[128,256], index: 1, kind: input, shape index: {}]   ;;  %s559_s2 = inlined_call_operand.hbm [shape: f32[1,256], index: 2, kind: input, shape index: {}]   ;;  %s560_s3 = inlined_call_operand.hbm [shape: f32[256,128], index: 3, kind: input, shape index: {}]   ;;  %s561_s4 = inlined_call_operand.vmem [shape: f32[1,128], index: 4, kind: input, shape index: {}]   ;;  %s562_s5 = inlined_call_operand.hbm [shape: f32[128,128], index: 5, kind: input, shape index: {}]   ;;  %s563_s6 = inlined_call_operand.vmem [shape: f32[1,128], index: 6, kind: input, shape index: {}]   ;;  %s564_s7 = inlined_call_operand.hbm [shape: f32[8,128], index: 7, kind: output, shape index: {}]  }
   0x1   :  { %13 = vsyncpa [#allocation6], 0 }
   0x2   :  { %14 = vsyncpa [#allocation9], 0  ;;  %s31_s26 = sshll.u32 %s558_s1, 4  ;;  %s32_s26 = int_to_ptr.hbm [resolvable:$true] %s31_s26 }
   0x3   :  { %15 = vsyncpa [#allocation4], 0  ;;  %s483_s27 = smov [#allocation5]   ;;  %s55_s8 = sshll.u32 %s560_s3, 4  ;;  %s56_s8 = int_to_ptr.hbm [resolvable:$true] %s55_s8 }
   0x4   :  { %s33_s28 = sshll.u32 %s483_s27, 4  ;;  %s484_s9 = smov 256   ;;  %s34_s28 = int_to_ptr.vmem [resolvable:$true] %s33_s28 }
   0x5   :  { %s485_s10 = smov 16   ;;  %s486_s11 = smov [#allocation8]  }
   0x6   :  { %39 = dma.hbm_to_vmem [thread:$0]  %s32_s26, 4096, %s34_s28, [#allocation6], %s484_s9, %s484_s9, %s485_s10  }
   0x7   :  { %s57_s12 = sshll.u32 %s486_s11, 4  ;;  %s487_s13 = smov 128   ;;  %s58_s12 = int_to_ptr.vmem [resolvable:$true] %s57_s12 }
   0x8   :  { %s488_s14 = smov 8   ;;  %s21_s16 = sshll.u32 %s557_s0, 4  ;;  %s22_s16 = int_to_ptr.hbm [resolvable:$true] %s21_s16 }
   0x9   :  { %63 = dma.hbm_to_vmem [thread:$0]  %s56_s8, 4096, %s58_s12, [#allocation9], %s487_s13, %s487_s13, %s488_s14  }
   0xa   :  { %s489_s17 = smov [#allocation2]   ;;  %s45_s20 = sshll.u32 %s559_s2, 4  ;;  %s46_s20 = int_to_ptr.hbm [resolvable:$true] %s45_s20 }
   0xb   :  { %s23_s18 = sshll.u32 %s489_s17, 4  ;;  %s490_s21 = smov [#allocation7]   ;;  %s24_s18 = int_to_ptr.vmem [resolvable:$true] %s23_s18 }
   0xc   :  { %26 = dma.hbm_to_vmem [thread:$0]  %s22_s16, 128, %s24_s18, [#allocation3]  }
   0xd   :  { %s47_s22 = sshll.u32 %s490_s21, 4  ;;  %s70_s25 = sshll.u32 %s562_s5, 4  ;;  %s48_s22 = int_to_ptr.vmem [resolvable:$true] %s47_s22  ;;  %s71_s25 = int_to_ptr.hbm [resolvable:$true] %s70_s25 }
   0xe   :  { %50 = dma.hbm_to_vmem [thread:$0]  %s46_s20, 32, %s48_s22, [#allocation6]  }
   0xf   :  { %s491_s0 = smov [#allocation10]  }
  0x10   :  { %s72_s26 = sshll.u32 %s491_s0, 4  ;;  %s73_s26 = int_to_ptr.vmem [resolvable:$true] %s72_s26 }
  0x11   :  { %78 = dma.hbm_to_vmem [thread:$0]  %s71_s25, 2048, %s73_s26, [#allocation9], %s487_s13, %s487_s13, %s488_s14  }
  0x12   :  { %475 = dma.done.wait [#allocation3], 128  }
  0x13   :  { %476 = vsyncadd [#allocation3], 4294967168 }
  0x14   :  { %477 = dma.done.wait [#allocation6], 4128  }
  0x15   :  { %478 = vsyncadd [#allocation6], 4294963168 }
  0x16   :  { %479 = dma.done.wait [#allocation9], 6144  }
  0x17   :  { %480 = vsyncadd [#allocation9], 4294961152  ;;  %v132_v0 = vld [vmem:[#allocation5 + $0xf0] sm:$0xff]  ;;  %v130_v1 = vld [vmem:[#allocation5 + $0xe0] sm:$0xff]  ;;  %s492_s29 = smov [#allocation11]   ;;  %s307_s10 = sshll.u32 %s564_s7, 4  ;;  %s308_s10 = int_to_ptr.hbm [resolvable:$true] %s307_s10 }
  0x18   :  { %v133_v2 = vld [vmem:[#allocation5 + $0xf8] sm:$0xff]  ;;  %140 = vmatpush.msra.mxu0 %v132_v0  ;;  %v131_v3 = vld [vmem:[#allocation5 + $0xe8] sm:$0xff]  ;;  %v128_v4 = vld [vmem:[#allocation5 + $0xd0] sm:$0xff]  ;;  %s305_s30 = sshll.u32 %s492_s29, 4  ;;  %s306_s30 = int_to_ptr.vmem [resolvable:$true] %s305_s30 }
  0x19   :  { %160 = vmatpush.msra.mxu1 %v133_v2  ;;  %v129_v5 = vld [vmem:[#allocation5 + $0xd8] sm:$0xff]  ;;  %v126_v6 = vld [vmem:[#allocation5 + $0xc0] sm:$0xff]  ;;  %v127_v7 = vld [vmem:[#allocation5 + $0xc8] sm:$0xff] }
  0x1a   :  { %141 = vmatpush.msra.mxu0 %v130_v1  ;;  %v124_v8 = vld [vmem:[#allocation5 + $0xb0] sm:$0xff]  ;;  %v125_v9 = vld [vmem:[#allocation5 + $0xb8] sm:$0xff]  ;;  %v122_v10 = vld [vmem:[#allocation5 + $0xa0] sm:$0xff] }
  0x1b   :  { %161 = vmatpush.msra.mxu1 %v131_v3  ;;  %v123_v11 = vld [vmem:[#allocation5 + $0xa8] sm:$0xff]  ;;  %v120_v12 = vld [vmem:[#allocation5 + $0x90] sm:$0xff]  ;;  %v121_v13 = vld [vmem:[#allocation5 + $0x98] sm:$0xff] }
  0x1c   :  { %142 = vmatpush.msra.mxu0 %v128_v4  ;;  %v197_v14 = vld [vmem:[#allocation8 + $0x78] sm:$0xff]  ;;  %v196_v15 = vld [vmem:[#allocation8 + $0x70] sm:$0xff]  ;;  %v119_v18 = vld [vmem:[#allocation5 + $0x88] sm:$0xff] }
  0x1d   :  { %162 = vmatpush.msra.mxu1 %v129_v5  ;;  %v213_v16 = vld [vmem:[#allocation8 + $0xf8] sm:$0xff]  ;;  %218 = vmatpush.msra.mxu2 %v197_v14  ;;  %v212_v19 = vld [vmem:[#allocation8 + $0xf0] sm:$0xff]  ;;  %v195_v20 = vld [vmem:[#allocation8 + $0x68] sm:$0xff] }
  0x1e   :  { %143 = vmatpush.msra.mxu0 %v126_v6  ;;  %v118_v17 = vld [vmem:[#allocation5 + $0x80] sm:$0xff]  ;;  %238 = vmatpush.msra.mxu3 %v213_v16  ;;  %v211_v21 = vld [vmem:[#allocation8 + $0xe8] sm:$0xff]  ;;  %v117_v23 = vld [vmem:[#allocation5 + $0x78] sm:$0xff] }
  0x1f   :  { %163 = vmatpush.msra.mxu1 %v127_v7  ;;  %v116_v22 = vld [vmem:[#allocation5 + $0x70] sm:$0xff]  ;;  %219 = vmatpush.msra.mxu2 %v196_v15  ;;  %v194_v24 = vld [vmem:[#allocation8 + $0x60] sm:$0xff]  ;;  %v193_v28 = vld [vmem:[#allocation8 + $0x58] sm:$0xff] }
  0x20   :  { %144 = vmatpush.msra.mxu0 %v124_v8  ;;  %239 = vmatpush.msra.mxu3 %v212_v19  ;;  %v210_v25 = vld [vmem:[#allocation8 + $0xe0] sm:$0xff]  ;;  %v209_v29 = vld [vmem:[#allocation8 + $0xd8] sm:$0xff]  ;;  %v112_v30 = vld [vmem:[#allocation5 + $0x50] sm:$0xff] }
  0x21   :  { %164 = vmatpush.msra.mxu1 %v125_v9  ;;  %v114_v26 = vld [vmem:[#allocation5 + $0x60] sm:$0xff]  ;;  %v115_v27 = vld [vmem:[#allocation5 + $0x68] sm:$0xff]  ;;  %220 = vmatpush.msra.mxu2 %v195_v20  ;;  %v113_v31 = vld [vmem:[#allocation5 + $0x58] sm:$0xff] }
  0x22   :  { %145 = vmatpush.msra.mxu0 %v122_v10  ;;  %240 = vmatpush.msra.mxu3 %v211_v21  ;;  %v192_v32 = vld [vmem:[#allocation8 + $0x50] sm:$0xff]  ;;  %v110_v34 = vld [vmem:[#allocation5 + $0x40] sm:$0xff]  ;;  %v111_v35 = vld [vmem:[#allocation5 + $0x48] sm:$0xff] }
  0x23   :  { %165 = vmatpush.msra.mxu1 %v123_v11  ;;  %221 = vmatpush.msra.mxu2 %v194_v24  ;;  %v208_v33 = vld [vmem:[#allocation8 + $0xd0] sm:$0xff]  ;;  %v191_v36 = vld [vmem:[#allocation8 + $0x48] sm:$0xff]  ;;  %v190_v40 = vld [vmem:[#allocation8 + $0x40] sm:$0xff] }
  0x24   :  { %146 = vmatpush.msra.mxu0 %v120_v12  ;;  %241 = vmatpush.msra.mxu3 %v210_v25  ;;  %v207_v37 = vld [vmem:[#allocation8 + $0xc8] sm:$0xff]  ;;  %v109_v39 = vld [vmem:[#allocation5 + $0x38] sm:$0xff]  ;;  %v206_v41 = vld [vmem:[#allocation8 + $0xc0] sm:$0xff] }
  0x25   :  { %166 = vmatpush.msra.mxu1 %v121_v13  ;;  %222 = vmatpush.msra.mxu2 %v193_v28  ;;  %v108_v38 = vld [vmem:[#allocation5 + $0x30] sm:$0xff]  ;;  %v106_v42 = vld [vmem:[#allocation5 + $0x20] sm:$0xff]  ;;  %v107_v43 = vld [vmem:[#allocation5 + $0x28] sm:$0xff] }
  0x26   :  { %147 = vmatpush.msra.mxu0 %v118_v17  ;;  %242 = vmatpush.msra.mxu3 %v209_v29  ;;  %v189_v44 = vld [vmem:[#allocation8 + $0x38] sm:$0xff]  ;;  %v104_v46 = vld [vmem:[#allocation5 + $0x10] sm:$0xff]  ;;  %v103_v51 = vld [vmem:[#allocation5 + $0x8] sm:$0xff] }
  0x27   :  { %167 = vmatpush.msra.mxu1 %v119_v18  ;;  %223 = vmatpush.msra.mxu2 %v192_v32  ;;  %v205_v45 = vld [vmem:[#allocation8 + $0xb8] sm:$0xff]  ;;  %v188_v48 = vld [vmem:[#allocation8 + $0x30] sm:$0xff]  ;;  %v187_v53 = vld [vmem:[#allocation8 + $0x28] sm:$0xff] }
  0x28   :  { %148 = vmatpush.msra.mxu0 %v116_v22  ;;  %243 = vmatpush.msra.mxu3 %v208_v33  ;;  %v105_v47 = vld [vmem:[#allocation5 + $0x18] sm:$0xff]  ;;  %v102_v50 = vld [vmem:[#allocation5] sm:$0xff]  ;;  %v203_v54 = vld [vmem:[#allocation8 + $0xa8] sm:$0xff] }
  0x29   :  { %168 = vmatpush.msra.mxu1 %v117_v23  ;;  %224 = vmatpush.msra.mxu2 %v191_v36  ;;  %v204_v49 = vld [vmem:[#allocation8 + $0xb0] sm:$0xff]  ;;  %v186_v55 = vld [vmem:[#allocation8 + $0x20] sm:$0xff]  ;;  %v185_v57 = vld [vmem:[#allocation8 + $0x18] sm:$0xff] }
  0x2a   :  { %149 = vmatpush.msra.mxu0 %v114_v26  ;;  %244 = vmatpush.msra.mxu3 %v207_v37  ;;  %v101_v52 = vld [vmem:[#allocation2] sm:$0xff]  ;;  %v202_v56 = vld [vmem:[#allocation8 + $0xa0] sm:$0xff]  ;;  %v183_v60 = vld [vmem:[#allocation8 + $0x8] sm:$0xff] }
  0x2b   :  { %169 = vmatpush.msra.mxu1 %v115_v27  ;;  %225 = vmatpush.msra.mxu2 %v190_v40  ;;  %v184_v58 = vld [vmem:[#allocation8 + $0x10] sm:$0xff]  ;;  %v201_v59 = vld [vmem:[#allocation8 + $0x98] sm:$0xff]  ;;  %v182_v62 = vld [vmem:[#allocation8] sm:$0xff] }
  0x2c   :  { %150 = vmatpush.msra.mxu0 %v112_v30  ;;  %245 = vmatpush.msra.mxu3 %v206_v41  ;;  %v200_v61 = vld [vmem:[#allocation8 + $0x90] sm:$0xff]  ;;  %v199_v63 = vld [vmem:[#allocation8 + $0x88] sm:$0xff]  ;;  %v198_v0 = vld [vmem:[#allocation8 + $0x80] sm:$0xff] }
  0x2d   :  { %170 = vmatpush.msra.mxu1 %v113_v31  ;;  %226 = vmatpush.msra.mxu2 %v189_v44  ;;  %v274_v1 = vld [vmem:[#allocation10 + $0x78] sm:$0xff]  ;;  %v273_v2 = vld [vmem:[#allocation10 + $0x70] sm:$0xff]  ;;  %v272_v3 = vld [vmem:[#allocation10 + $0x68] sm:$0xff] }
  0x2e   :  { %151 = vmatpush.msra.mxu0 %v110_v34  ;;  %246 = vmatpush.msra.mxu3 %v205_v45  ;;  %v271_v4 = vld [vmem:[#allocation10 + $0x60] sm:$0xff]  ;;  %v270_v5 = vld [vmem:[#allocation10 + $0x58] sm:$0xff]  ;;  %v269_v6 = vld [vmem:[#allocation10 + $0x50] sm:$0xff] }
  0x2f   :  { %171 = vmatpush.msra.mxu1 %v111_v35  ;;  %227 = vmatpush.msra.mxu2 %v188_v48  ;;  %v268_v7 = vld [vmem:[#allocation10 + $0x48] sm:$0xff]  ;;  %v267_v8 = vld [vmem:[#allocation10 + $0x40] sm:$0xff]  ;;  %v266_v9 = vld [vmem:[#allocation10 + $0x38] sm:$0xff] }
  0x30   :  { %152 = vmatpush.msra.mxu0 %v108_v38  ;;  %247 = vmatpush.msra.mxu3 %v204_v49  ;;  %v265_v10 = vld [vmem:[#allocation10 + $0x30] sm:$0xff]  ;;  %v264_v11 = vld [vmem:[#allocation10 + $0x28] sm:$0xff]  ;;  %v263_v12 = vld [vmem:[#allocation10 + $0x20] sm:$0xff] }
  0x31   :  { %172 = vmatpush.msra.mxu1 %v109_v39  ;;  %228 = vmatpush.msra.mxu2 %v187_v53  ;;  %v134_v13 = vld [vmem:[#allocation7] sm:$0x3]  ;;  %v261_v23 = vld [vmem:[#allocation10 + $0x10] sm:$0xff]  ;;  %v260_v24 = vld [vmem:[#allocation10 + $0x8] sm:$0xff] }
  0x32   :  { %153 = vmatpush.msra.mxu0 %v106_v42  ;;  %248 = vmatpush.msra.mxu3 %v203_v54  ;;  %v136_v14 = vperm.slane %v134_v13, 0  ;;  %v137_v15 = vperm.slane %v134_v13, 1  ;;  %v262_v22 = vld [vmem:[#allocation10 + $0x18] sm:$0xff]  ;;  %v259_v25 = vld [vmem:[#allocation10] sm:$0xff]  ;;  %v329_v26 = vld [vmem:[%s561_s4] ss:$0 sm:$0xff] }
  0x33   :  { %173 = vmatpush.msra.mxu1 %v107_v43  ;;  %229 = vmatpush.msra.mxu2 %v186_v55  ;;  %v330_v32 = vld [vmem:[%s563_s6] ss:$0 sm:$0xff] }
  0x34   :  { %154 = vmatpush.msra.mxu0 %v104_v46  ;;  %249 = vmatpush.msra.mxu3 %v202_v56 }
  0x35   :  { %174 = vmatpush.msra.mxu1 %v105_v47  ;;  %230 = vmatpush.msra.mxu2 %v185_v57 }
  0x36   :  { %155 = vmatpush.msra.mxu0 %v102_v50  ;;  %250 = vmatpush.msra.mxu3 %v201_v59 }
  0x37   :  { %175 = vmatpush.msra.mxu1 %v103_v51  ;;  %156 = vmatmul.f32.vlgmr.msra.gmra.mxu0 %v101_v52 }
  0x38   :  { %176 = vmatmul.f32.vlgmr.msra.gmra.mxu1 %v101_v52  ;;  %231 = vmatpush.msra.mxu2 %v184_v58 }
  0x39   :  { %251 = vmatpush.msra.mxu3 %v200_v61  ;;  %279 = vmatpush.msrb.mxu0 %v274_v1 }
  0x3a   :  { %232 = vmatpush.msra.mxu2 %v183_v60 }
  0x3b   :  { %252 = vmatpush.msra.mxu3 %v199_v63  ;;  %280 = vmatpush.msrb.mxu0 %v273_v2 }
  0x3c   :  { %233 = vmatpush.msra.mxu2 %v182_v62 }
  0x3d   :  { %253 = vmatpush.msra.mxu3 %v198_v0  ;;  %281 = vmatpush.msrb.mxu0 %v272_v3 }
  0x3f   :  { %282 = vmatpush.msrb.mxu0 %v271_v4 }
  0x41   :  { %283 = vmatpush.msrb.mxu0 %v270_v5 }
  0x43   :  { %284 = vmatpush.msrb.mxu0 %v269_v6 }
  0x45   :  { %285 = vmatpush.msrb.mxu0 %v268_v7 }
  0x47   :  { %286 = vmatpush.msrb.mxu0 %v267_v8 }
  0x49   :  { %287 = vmatpush.msrb.mxu0 %v266_v9 }
  0x4b   :  { %288 = vmatpush.msrb.mxu0 %v265_v10 }
  0x4d   :  { %289 = vmatpush.msrb.mxu0 %v264_v11 }
  0x4f   :  { %290 = vmatpush.msrb.mxu0 %v263_v12 }
  0x51   :  { %291 = vmatpush.msrb.mxu0 %v262_v22 }
  0x53   :  { %292 = vmatpush.msrb.mxu0 %v261_v23 }
  0x55   :  { %293 = vmatpush.msrb.mxu0 %v260_v24 }
  0x57   :  { %294 = vmatpush.msrb.mxu0 %v259_v25 }
  0xb4   :  { %v157_v16 = vpop.f32.mrf.mxu0 }
  0xb5   :  { %v177_v17 = vpop.f32.mrf.mxu1  ;;  %v158_v18 = vadd.f32 %v157_v16, %v136_v14 }
  0xb6   :  { %v178_v19 = vadd.f32 %v177_v17, %v137_v15 }
  0xb7   :  { %v180_v20 = vmax.f32 %v158_v18, 0.0 }
  0xb8   :  { %v181_v21 = vmax.f32 %v178_v19, 0.0 }
  0xb9   :  { %234 = vmatmul.f32.vlgmr.msra.gmra.mxu2 %v180_v20 }
  0xba   :  { %254 = vmatmul.f32.vlgmr.msra.gmra.mxu3 %v181_v21 }
 0x13c   :  { %v235_v27 = vpop.f32.mrf.mxu2 }
 0x13d   :  { %v255_v28 = vpop.f32.mrf.mxu3  ;;  %v236_v29 = vadd.f32 %v329_v26, %v235_v27 }
 0x13f   :  { %v256_v30 = vadd.f32 %v255_v28, %v236_v29 }
 0x141   :  { %v258_v31 = vmax.f32 %v256_v30, 0.0 }
 0x143   :  { %295 = vmatmul.f32.vlgmr.msrb.gmra.mxu0 %v258_v31 }
 0x1c0   :  { %v296_v33 = vpop.f32.mrf.mxu0 }
 0x1c1   :  { %v297_v34 = vadd.f32 %v330_v32, %v296_v33 }
 0x1c3   :  { %299 = vst [vmem:[#allocation11] sm:$0xff] %v297_v34 }
 0x1c4   :  { %310 = dma.vmem_to_hbm [thread:$0]  %s306_s30, 128, %s308_s10, [#allocation4]  }
 0x1c5   :  { %481 = dma.done.wait [#allocation4], 128  }
 0x1c6   :  { %482 = vsyncadd [#allocation4], 4294967168 }
 0x1c7   :  { %315 = vsyncpa [#allocation3], 1 }
 0x1c8   :  { %316 = vsyncpa [#allocation6], 1 }
 0x1c9   :  { %317 = vsyncpa [#allocation9], 1 }
 0x1ca   :  { %318 = vsyncpa [#allocation4], 1 }

</bundles_post_ra>
